<compile_context>
chip_gen: v5e
topology: v5e:2x2
jax: 0.10.0
libtpu: 0.0.40
codegen_flags: <defaults>
</compile_context>

<pallas_src>
import functools

import jax
import jax.numpy as jnp
from jax.experimental import pallas as pl
from jax.experimental.pallas import tpu as pltpu


_K_PAD = 896    # 784 padded up to a multiple of 128 (7 * 128)
_N_PAD = 128    # 10 padded up to one full lane width
_TILE_B_MAX = 1024


def _round_up(x: int, m: int) -> int:
    return (x + m - 1) // m * m


def _linear_kernel(x_ref, w_ref, b_ref, o_ref):
    # x_ref: (TILE_B, 896)  w_ref: (896, 128)  b_ref: (1, 128)  o_ref: (TILE_B, 128)
    acc = jnp.dot(x_ref[...], w_ref[...], preferred_element_type=jnp.float32)
    o_ref[...] = (acc + b_ref[...]).astype(o_ref.dtype)


@functools.partial(jax.jit, static_argnames=())
def net_forward(x_nchw, weight_oi, bias):
    """Forward pass of Net.

    x_nchw:    (B, 1, 28, 28) float32 (any leading batch; reshaped like
               torch's x.view(-1, 784))
    weight_oi: (10, 784) float32  (PyTorch nn.Linear layout: (out, in))
    bias:      (10,) float32
    returns:   (B, 10) float32
    """
    B = x_nchw.shape[0]
    K = 784
    N = 10
    dtype = x_nchw.dtype

    x2d = x_nchw.reshape(B, K)                       # == torch x.view(-1, 784)

    # Batch tile: multiple of 8 (sublane), capped for VMEM on all generations.
    tile_b = min(_TILE_B_MAX, _round_up(B, 8))
    b_pad = _round_up(B, tile_b)

    # Zero-pad activations / weights / bias to lane-aligned shapes.
    x_p = jnp.pad(x2d, ((0, b_pad - B), (0, _K_PAD - K)))
    w_p = jnp.pad(weight_oi.T.astype(dtype), ((0, _K_PAD - K), (0, _N_PAD - N)))
    b_p = jnp.pad(bias.astype(dtype).reshape(1, N), ((0, 0), (0, _N_PAD - N)))

    grid = (b_pad // tile_b,)

    cost = pl.CostEstimate(
        flops=2 * b_pad * _K_PAD * _N_PAD,
        transcendentals=0,
        bytes_accessed=(b_pad * _K_PAD + _K_PAD * _N_PAD + b_pad * _N_PAD) * 4,
    )

    out_padded = pl.pallas_call(
        _linear_kernel,
        out_shape=jax.ShapeDtypeStruct((b_pad, _N_PAD), dtype),
        grid_spec=pltpu.PrefetchScalarGridSpec(
            num_scalar_prefetch=0,
            grid=grid,
            in_specs=[
                # Activation: one batch tile per grid step (pipelined).
                pl.BlockSpec((tile_b, _K_PAD), lambda i: (i, 0)),
                # Weight / bias: same block every step -> VMEM resident.
                pl.BlockSpec((_K_PAD, _N_PAD), lambda i: (0, 0)),
                pl.BlockSpec((1, _N_PAD), lambda i: (0, 0)),
            ],
            out_specs=pl.BlockSpec((tile_b, _N_PAD), lambda i: (i, 0)),
        ),
        compiler_params=pltpu.CompilerParams(
            dimension_semantics=("parallel",),   # batch rows independent
            vmem_limit_bytes=64 << 20,
        ),
        cost_estimate=cost,
    )(x_p, w_p, b_p)

    # Slice away batch / lane padding (padding cols of W & bias are zero, so
    # the first 10 columns are exactly the unpadded result).
    return out_padded[:B, :N]


if __name__ == "__main__":
    key = jax.random.PRNGKey(0)
    kx, kw, kb = jax.random.split(key, 3)

    B = 2
    x = jax.random.normal(kx, (B, 1, 28, 28), dtype=jnp.float32)
    # Deterministic parameter init (matches nn.Linear shapes: (10, 784), (10,))
    weight = jax.random.normal(kw, (10, 784), dtype=jnp.float32) * 0.02
    bias = jax.random.normal(kb, (10,), dtype=jnp.float32) * 0.02

    y = net_forward(x, weight, bias)
    jax.block_until_ready(y)

    # Cross-check against plain-JAX reference.
    y_ref = x.reshape(B, 784) @ weight.T + bias
    assert y.shape == (B, 10)
    assert jnp.allclose(y, y_ref, atol=1e-4, rtol=1e-4)

    print("KERNEL_OK")
</pallas_src>

<mosaic_0001>
module attributes {stable_mosaic.version = 11 : i64} {
  func.func @_linear_kernel(%arg0: i32, %arg1: memref<8x896xf32, #tpu.memory_space<vmem>>, %arg2: memref<896x128xf32, #tpu.memory_space<vmem>>, %arg3: memref<1x128xf32, #tpu.memory_space<vmem>>, %arg4: memref<8x128xf32, #tpu.memory_space<vmem>>) attributes {dimension_semantics = [#tpu.dimension_semantics<parallel>], iteration_bounds = array<i64: 1>, scalar_prefetch = 0 : i64, scratch_operands = 0 : i64, tpu.core_type = #tpu.core_type<tc>, window_params = [{transform_indices = @transform_0, window_bounds = array<i64: 8, 896>}, {pipeline_mode = #tpu.pipeline_mode<synchronous>, transform_indices = @transform_1, window_bounds = array<i64: 896, 128>}, {pipeline_mode = #tpu.pipeline_mode<synchronous>, transform_indices = @transform_2, window_bounds = array<i64: 1, 128>}, {transform_indices = @transform_3, window_bounds = array<i64: 8, 128>}]} {
    %c0 = arith.constant 0 : index
    %c0_0 = arith.constant 0 : index
    %0 = vector.load %arg1[%c0, %c0_0] : memref<8x896xf32, #tpu.memory_space<vmem>>, vector<8x896xf32>
    %c0_1 = arith.constant 0 : index
    %c0_2 = arith.constant 0 : index
    %1 = vector.load %arg2[%c0_1, %c0_2] : memref<896x128xf32, #tpu.memory_space<vmem>>, vector<896x128xf32>
    %cst = arith.constant dense<0.000000e+00> : vector<8x128xf32>
    %2 = tpu.matmul %0, %1, %cst {dimension_numbers = #tpu.dot_dimension_numbers<[1], [0], [0], [1], [0, 0, 1, 1], [], []>} : vector<8x896xf32>, vector<896x128xf32>, vector<8x128xf32> -> vector<8x128xf32>
    %c0_3 = arith.constant 0 : index
    %c0_4 = arith.constant 0 : index
    %3 = vector.load %arg3[%c0_3, %c0_4] : memref<1x128xf32, #tpu.memory_space<vmem>>, vector<1x128xf32>
    %4 = vector.broadcast %3 : vector<1x128xf32> to vector<8x128xf32>
    %5 = arith.addf %2, %4 : vector<8x128xf32>
    %c0_5 = arith.constant 0 : index
    %c0_6 = arith.constant 0 : index
    %6 = vector.load %arg4[%c0_5, %c0_6] : memref<8x128xf32, #tpu.memory_space<vmem>>, vector<8x128xf32>
    tpu.vector_store %arg4[%c0_5, %c0_6], %5 {strides = array<i32>} : memref<8x128xf32, #tpu.memory_space<vmem>>, vector<8x128xf32>,
    return
  }
  func.func @transform_0(%arg0: i32) -> (i32, i32) {
    %c0_i32 = arith.constant 0 : i32
    %c0_i32_0 = arith.constant 0 : i32
    return %arg0, %c0_i32 : i32, i32
  }
  func.func @transform_1(%arg0: i32) -> (i32, i32) {
    %c0_i32 = arith.constant 0 : i32
    %c0_i32_0 = arith.constant 0 : i32
    %c0_i32_1 = arith.constant 0 : i32
    return %c0_i32, %c0_i32_0 : i32, i32
  }
  func.func @transform_2(%arg0: i32) -> (i32, i32) {
    %c0_i32 = arith.constant 0 : i32
    %c0_i32_0 = arith.constant 0 : i32
    %c0_i32_1 = arith.constant 0 : i32
    return %c0_i32, %c0_i32_0 : i32, i32
  }
  func.func @transform_3(%arg0: i32) -> (i32, i32) {
    %c0_i32 = arith.constant 0 : i32
    %c0_i32_0 = arith.constant 0 : i32
    return %arg0, %c0_i32 : i32, i32
  }
}

</mosaic_0001>

<bundles_post_ra>
// kernel: net_forward.1
= control target key start
LH: loop header
LB: loop body
LE: loop exit
PB: predicated region body
PF: predicated region fallthrough
CT: control target
= control target key end

     0   :  { %s666_s1 = inlined_call_operand.vmem [shape: f32[896,128], index: 1, kind: input, shape index: {}]   ;;  %s667_s2 = inlined_call_operand.vmem [shape: f32[1,128], index: 2, kind: input, shape index: {}]   ;;  %s668_s0 = inlined_call_operand.vmem [shape: f32[8,896], index: 0, kind: input, shape index: {}]   ;;  %s669_s3 = inlined_call_operand.vmem [shape: f32[8,128], index: 3, kind: output, shape index: {}]  }
   0x1   :  { %v68_v0 = vld [vmem:[%s666_s1 + $0x178] sm:$0xff]  ;;  %v67_v2 = vld [vmem:[%s666_s1 + $0x170] sm:$0xff]  ;;  %v66_v5 = vld [vmem:[%s666_s1 + $0x168] sm:$0xff] }
   0x2   :  { %v36_v1 = vld [vmem:[%s666_s1 + $0x78] sm:$0xff]  ;;  %177 = vmatpush.msra.mxu2 %v68_v0  ;;  %v35_v3 = vld [vmem:[%s666_s1 + $0x70] sm:$0xff]  ;;  %v34_v6 = vld [vmem:[%s666_s1 + $0x68] sm:$0xff] }
   0x3   :  { %137 = vmatpush.msra.mxu0 %v36_v1  ;;  %v52_v4 = vld [vmem:[%s666_s1 + $0xf8] sm:$0xff]  ;;  %v51_v7 = vld [vmem:[%s666_s1 + $0xf0] sm:$0xff]  ;;  %v50_v8 = vld [vmem:[%s666_s1 + $0xe8] sm:$0xff] }
   0x4   :  { %157 = vmatpush.msra.mxu1 %v52_v4  ;;  %178 = vmatpush.msra.mxu2 %v67_v2  ;;  %v65_v9 = vld [vmem:[%s666_s1 + $0x160] sm:$0xff]  ;;  %v64_v12 = vld [vmem:[%s666_s1 + $0x158] sm:$0xff]  ;;  %v63_v15 = vld [vmem:[%s666_s1 + $0x150] sm:$0xff] }
   0x5   :  { %138 = vmatpush.msra.mxu0 %v35_v3  ;;  %v33_v10 = vld [vmem:[%s666_s1 + $0x60] sm:$0xff]  ;;  %v32_v13 = vld [vmem:[%s666_s1 + $0x58] sm:$0xff]  ;;  %v31_v16 = vld [vmem:[%s666_s1 + $0x50] sm:$0xff] }
   0x6   :  { %158 = vmatpush.msra.mxu1 %v51_v7  ;;  %179 = vmatpush.msra.mxu2 %v66_v5  ;;  %v49_v11 = vld [vmem:[%s666_s1 + $0xe0] sm:$0xff]  ;;  %v48_v14 = vld [vmem:[%s666_s1 + $0xd8] sm:$0xff]  ;;  %v47_v17 = vld [vmem:[%s666_s1 + $0xd0] sm:$0xff] }
   0x7   :  { %139 = vmatpush.msra.mxu0 %v34_v6  ;;  %v62_v18 = vld [vmem:[%s666_s1 + $0x148] sm:$0xff]  ;;  %v61_v21 = vld [vmem:[%s666_s1 + $0x140] sm:$0xff]  ;;  %v84_v23 = vld [vmem:[%s666_s1 + $0x1f8] sm:$0xff] }
   0x8   :  { %159 = vmatpush.msra.mxu1 %v50_v8  ;;  %180 = vmatpush.msra.mxu2 %v65_v9  ;;  %v30_v19 = vld [vmem:[%s666_s1 + $0x48] sm:$0xff]  ;;  %v29_v22 = vld [vmem:[%s666_s1 + $0x40] sm:$0xff]  ;;  %v83_v25 = vld [vmem:[%s666_s1 + $0x1f0] sm:$0xff] }
   0x9   :  { %140 = vmatpush.msra.mxu0 %v33_v10  ;;  %v46_v20 = vld [vmem:[%s666_s1 + $0xc8] sm:$0xff]  ;;  %v45_v24 = vld [vmem:[%s666_s1 + $0xc0] sm:$0xff]  ;;  %v60_v26 = vld [vmem:[%s666_s1 + $0x138] sm:$0xff]  ;;  %197 = vmatpush.msra.mxu3 %v84_v23 }
   0xa   :  { %160 = vmatpush.msra.mxu1 %v49_v11  ;;  %181 = vmatpush.msra.mxu2 %v64_v12  ;;  %v28_v27 = vld [vmem:[%s666_s1 + $0x38] sm:$0xff]  ;;  %v82_v29 = vld [vmem:[%s666_s1 + $0x1e8] sm:$0xff]  ;;  %v59_v30 = vld [vmem:[%s666_s1 + $0x130] sm:$0xff] }
   0xb   :  { %141 = vmatpush.msra.mxu0 %v32_v13  ;;  %v44_v28 = vld [vmem:[%s666_s1 + $0xb8] sm:$0xff]  ;;  %v27_v31 = vld [vmem:[%s666_s1 + $0x30] sm:$0xff]  ;;  %198 = vmatpush.msra.mxu3 %v83_v25  ;;  %v81_v33 = vld [vmem:[%s666_s1 + $0x1e0] sm:$0xff] }
   0xc   :  { %161 = vmatpush.msra.mxu1 %v48_v14  ;;  %182 = vmatpush.msra.mxu2 %v63_v15  ;;  %v43_v32 = vld [vmem:[%s666_s1 + $0xb0] sm:$0xff]  ;;  %v58_v34 = vld [vmem:[%s666_s1 + $0x128] sm:$0xff]  ;;  %v80_v37 = vld [vmem:[%s666_s1 + $0x1d8] sm:$0xff] }
   0xd   :  { %142 = vmatpush.msra.mxu0 %v31_v16  ;;  %v26_v35 = vld [vmem:[%s666_s1 + $0x28] sm:$0xff]  ;;  %199 = vmatpush.msra.mxu3 %v82_v29  ;;  %v57_v38 = vld [vmem:[%s666_s1 + $0x120] sm:$0xff]  ;;  %v79_v41 = vld [vmem:[%s666_s1 + $0x1d0] sm:$0xff] }
   0xe   :  { %162 = vmatpush.msra.mxu1 %v47_v17  ;;  %183 = vmatpush.msra.mxu2 %v62_v18  ;;  %v42_v36 = vld [vmem:[%s666_s1 + $0xa8] sm:$0xff]  ;;  %v25_v39 = vld [vmem:[%s666_s1 + $0x20] sm:$0xff]  ;;  %v56_v42 = vld [vmem:[%s666_s1 + $0x118] sm:$0xff] }
   0xf   :  { %143 = vmatpush.msra.mxu0 %v30_v19  ;;  %200 = vmatpush.msra.mxu3 %v81_v33  ;;  %v41_v40 = vld [vmem:[%s666_s1 + $0xa0] sm:$0xff]  ;;  %v24_v43 = vld [vmem:[%s666_s1 + $0x18] sm:$0xff]  ;;  %v78_v45 = vld [vmem:[%s666_s1 + $0x1c8] sm:$0xff] }
  0x10   :  { %163 = vmatpush.msra.mxu1 %v46_v20  ;;  %184 = vmatpush.msra.mxu2 %v61_v21  ;;  %v40_v44 = vld [vmem:[%s666_s1 + $0x98] sm:$0xff]  ;;  %v55_v46 = vld [vmem:[%s666_s1 + $0x110] sm:$0xff]  ;;  %v77_v49 = vld [vmem:[%s666_s1 + $0x1c0] sm:$0xff] }
  0x11   :  { %144 = vmatpush.msra.mxu0 %v29_v22  ;;  %201 = vmatpush.msra.mxu3 %v80_v37  ;;  %v23_v47 = vld [vmem:[%s666_s1 + $0x10] sm:$0xff]  ;;  %v54_v50 = vld [vmem:[%s666_s1 + $0x108] sm:$0xff]  ;;  %v76_v53 = vld [vmem:[%s666_s1 + $0x1b8] sm:$0xff] }
  0x12   :  { %164 = vmatpush.msra.mxu1 %v45_v24  ;;  %185 = vmatpush.msra.mxu2 %v60_v26  ;;  %v39_v48 = vld [vmem:[%s666_s1 + $0x90] sm:$0xff]  ;;  %v22_v51 = vld [vmem:[%s666_s1 + $0x8] sm:$0xff]  ;;  %v53_v54 = vld [vmem:[%s666_s1 + $0x100] sm:$0xff] }
  0x13   :  { %145 = vmatpush.msra.mxu0 %v28_v27  ;;  %202 = vmatpush.msra.mxu3 %v79_v41  ;;  %v38_v52 = vld [vmem:[%s666_s1 + $0x88] sm:$0xff]  ;;  %v21_v55 = vld [vmem:[%s666_s1] sm:$0xff]  ;;  %v132_v56 = vld [vmem:[%s666_s1 + $0x378] sm:$0xff] }
  0x14   :  { %165 = vmatpush.msra.mxu1 %v44_v28  ;;  %186 = vmatpush.msra.mxu2 %v59_v30  ;;  %v100_v57 = vld [vmem:[%s666_s1 + $0x278] sm:$0xff]  ;;  %v37_v58 = vld [vmem:[%s666_s1 + $0x80] sm:$0xff]  ;;  %v75_v59 = vld [vmem:[%s666_s1 + $0x1b0] sm:$0xff] }
  0x15   :  { %146 = vmatpush.msra.mxu0 %v27_v31  ;;  %203 = vmatpush.msra.mxu3 %v78_v45  ;;  %v131_v60 = vld [vmem:[%s666_s1 + $0x370] sm:$0xff]  ;;  %v116_v62 = vld [vmem:[%s666_s1 + $0x2f8] sm:$0xff]  ;;  %v74_v63 = vld [vmem:[%s666_s1 + $0x1a8] sm:$0xff] }
  0x16   :  { %166 = vmatpush.msra.mxu1 %v43_v32  ;;  %187 = vmatpush.msra.mxu2 %v58_v34  ;;  %v99_v61 = vld [vmem:[%s666_s1 + $0x270] sm:$0xff]  ;;  %v130_v0 = vld [vmem:[%s666_s1 + $0x368] sm:$0xff]  ;;  %v73_v3 = vld [vmem:[%s666_s1 + $0x1a0] sm:$0xff] }
  0x17   :  { %147 = vmatpush.msra.mxu0 %v26_v35  ;;  %204 = vmatpush.msra.mxu3 %v77_v49  ;;  %v98_v1 = vld [vmem:[%s666_s1 + $0x268] sm:$0xff]  ;;  %v115_v2 = vld [vmem:[%s666_s1 + $0x2f0] sm:$0xff]  ;;  %v129_v4 = vld [vmem:[%s666_s1 + $0x360] sm:$0xff] }
  0x18   :  { %167 = vmatpush.msra.mxu1 %v42_v36  ;;  %188 = vmatpush.msra.mxu2 %v57_v38  ;;  %v97_v5 = vld [vmem:[%s666_s1 + $0x260] sm:$0xff]  ;;  %v114_v6 = vld [vmem:[%s666_s1 + $0x2e8] sm:$0xff]  ;;  %v72_v7 = vld [vmem:[%s666_s1 + $0x198] sm:$0xff] }
  0x19   :  { %148 = vmatpush.msra.mxu0 %v25_v39  ;;  %205 = vmatpush.msra.mxu3 %v76_v53  ;;  %v128_v8 = vld [vmem:[%s666_s1 + $0x358] sm:$0xff]  ;;  %v113_v10 = vld [vmem:[%s666_s1 + $0x2e0] sm:$0xff]  ;;  %v71_v11 = vld [vmem:[%s666_s1 + $0x190] sm:$0xff] }
  0x1a   :  { %168 = vmatpush.msra.mxu1 %v41_v40  ;;  %189 = vmatpush.msra.mxu2 %v56_v42  ;;  %v96_v9 = vld [vmem:[%s666_s1 + $0x258] sm:$0xff]  ;;  %v127_v12 = vld [vmem:[%s666_s1 + $0x350] sm:$0xff]  ;;  %v70_v15 = vld [vmem:[%s666_s1 + $0x188] sm:$0xff] }
  0x1b   :  { %149 = vmatpush.msra.mxu0 %v24_v43  ;;  %206 = vmatpush.msra.mxu3 %v75_v59  ;;  %v95_v13 = vld [vmem:[%s666_s1 + $0x250] sm:$0xff]  ;;  %v112_v14 = vld [vmem:[%s666_s1 + $0x2d8] sm:$0xff]  ;;  %v126_v16 = vld [vmem:[%s666_s1 + $0x348] sm:$0xff] }
  0x1c   :  { %169 = vmatpush.msra.mxu1 %v40_v44  ;;  %190 = vmatpush.msra.mxu2 %v55_v46  ;;  %v94_v17 = vld [vmem:[%s666_s1 + $0x248] sm:$0xff]  ;;  %v111_v18 = vld [vmem:[%s666_s1 + $0x2d0] sm:$0xff]  ;;  %v125_v20 = vld [vmem:[%s666_s1 + $0x340] sm:$0xff] }
  0x1d   :  { %150 = vmatpush.msra.mxu0 %v23_v47  ;;  %207 = vmatpush.msra.mxu3 %v74_v63  ;;  %v16_v19 = vld [vmem:[%s668_s0 + $0x10] sm:$0xff]  ;;  %v93_v21 = vld [vmem:[%s666_s1 + $0x240] sm:$0xff]  ;;  %v110_v22 = vld [vmem:[%s666_s1 + $0x2c8] sm:$0xff] }
  0x1e   :  { %170 = vmatpush.msra.mxu1 %v39_v48  ;;  %191 = vmatpush.msra.mxu2 %v54_v50  ;;  %v69_v23 = vld [vmem:[%s666_s1 + $0x180] sm:$0xff]  ;;  %v124_v24 = vld [vmem:[%s666_s1 + $0x338] sm:$0xff]  ;;  %v123_v28 = vld [vmem:[%s666_s1 + $0x330] sm:$0xff] }
  0x1f   :  { %151 = vmatpush.msra.mxu0 %v22_v51  ;;  %208 = vmatpush.msra.mxu3 %v73_v3  ;;  %v92_v25 = vld [vmem:[%s666_s1 + $0x238] sm:$0xff]  ;;  %v109_v26 = vld [vmem:[%s666_s1 + $0x2c0] sm:$0xff]  ;;  %v91_v29 = vld [vmem:[%s666_s1 + $0x230] sm:$0xff] }
  0x20   :  { %171 = vmatpush.msra.mxu1 %v38_v52  ;;  %192 = vmatpush.msra.mxu2 %v53_v54  ;;  %v14_v27 = vld [vmem:[%s668_s0] sm:$0xff]  ;;  %v108_v30 = vld [vmem:[%s666_s1 + $0x2b8] sm:$0xff]  ;;  %v122_v32 = vld [vmem:[%s666_s1 + $0x328] sm:$0xff] }
  0x21   :  { %152 = vmatpush.msra.mxu0 %v21_v55  ;;  %209 = vmatpush.msra.mxu3 %v72_v7  ;;  %v17_v31 = vld [vmem:[%s668_s0 + $0x18] sm:$0xff]  ;;  %v90_v33 = vld [vmem:[%s666_s1 + $0x228] sm:$0xff]  ;;  %v107_v34 = vld [vmem:[%s666_s1 + $0x2b0] sm:$0xff] }
  0x22   :  { %257 = vmatpush.msrb.mxu2 %v132_v56  ;;  %172 = vmatpush.msra.mxu1 %v37_v58  ;;  %v121_v35 = vld [vmem:[%s666_s1 + $0x320] sm:$0xff]  ;;  %v106_v37 = vld [vmem:[%s666_s1 + $0x2a8] sm:$0xff]  ;;  %v120_v38 = vld [vmem:[%s666_s1 + $0x318] sm:$0xff] }
  0x23   :  { %217 = vmatpush.msrb.mxu0 %v100_v57  ;;  %210 = vmatpush.msra.mxu3 %v71_v11  ;;  %v89_v36 = vld [vmem:[%s666_s1 + $0x220] sm:$0xff]  ;;  %v88_v39 = vld [vmem:[%s666_s1 + $0x218] sm:$0xff]  ;;  %v119_v41 = vld [vmem:[%s666_s1 + $0x310] sm:$0xff] }
  0x24   :  { %258 = vmatpush.msrb.mxu2 %v131_v60  ;;  %237 = vmatpush.msrb.mxu1 %v116_v62  ;;  %v105_v40 = vld [vmem:[%s666_s1 + $0x2a0] sm:$0xff]  ;;  %v15_v42 = vld [vmem:[%s668_s0 + $0x8] sm:$0xff]  ;;  %v87_v43 = vld [vmem:[%s666_s1 + $0x210] sm:$0xff] }
  0x25   :  { %218 = vmatpush.msrb.mxu0 %v99_v61  ;;  %211 = vmatpush.msra.mxu3 %v70_v15  ;;  %v104_v44 = vld [vmem:[%s666_s1 + $0x298] sm:$0xff]  ;;  %v118_v45 = vld [vmem:[%s666_s1 + $0x308] sm:$0xff]  ;;  %v103_v47 = vld [vmem:[%s666_s1 + $0x290] sm:$0xff] }
  0x26   :  { %259 = vmatpush.msrb.mxu2 %v130_v0  ;;  %238 = vmatpush.msrb.mxu1 %v115_v2  ;;  %v86_v46 = vld [vmem:[%s666_s1 + $0x208] sm:$0xff]  ;;  %v117_v48 = vld [vmem:[%s666_s1 + $0x300] sm:$0xff]  ;;  %v20_v49 = vld [vmem:[%s668_s0 + $0x30] sm:$0xff] }
  0x27   :  { %219 = vmatpush.msrb.mxu0 %v98_v1  ;;  %193 = vmatmul.f32.vlgmr.msra.gmra.mxu2 %v16_v19  ;;  %v85_v50 = vld [vmem:[%s666_s1 + $0x200] sm:$0xff]  ;;  %v102_v51 = vld [vmem:[%s666_s1 + $0x288] sm:$0xff] }
  0x28   :  { %260 = vmatpush.msrb.mxu2 %v129_v4  ;;  %239 = vmatpush.msrb.mxu1 %v114_v6  ;;  %v18_v52 = vld [vmem:[%s668_s0 + $0x20] sm:$0xff]  ;;  %v19_v54 = vld [vmem:[%s668_s0 + $0x28] sm:$0xff] }
  0x29   :  { %220 = vmatpush.msrb.mxu0 %v97_v5  ;;  %212 = vmatpush.msra.mxu3 %v69_v23  ;;  %v101_v53 = vld [vmem:[%s666_s1 + $0x280] sm:$0xff] }
  0x2a   :  { %261 = vmatpush.msrb.mxu2 %v128_v8  ;;  %240 = vmatpush.msrb.mxu1 %v113_v10  ;;  %v282_v55 = vld [vmem:[%s667_s2] ss:$0 sm:$0xff] }
  0x2b   :  { %221 = vmatpush.msrb.mxu0 %v96_v9  ;;  %213 = vmatmul.f32.vlgmr.msra.gmra.mxu3 %v17_v31 }
  0x2c   :  { %262 = vmatpush.msrb.mxu2 %v127_v12  ;;  %241 = vmatpush.msrb.mxu1 %v112_v14 }
  0x2d   :  { %222 = vmatpush.msrb.mxu0 %v95_v13  ;;  %173 = vmatmul.f32.vlgmr.msra.gmra.mxu1 %v15_v42 }
  0x2e   :  { %263 = vmatpush.msrb.mxu2 %v126_v16  ;;  %242 = vmatpush.msrb.mxu1 %v111_v18 }
  0x2f   :  { %223 = vmatpush.msrb.mxu0 %v94_v17 }
  0x30   :  { %264 = vmatpush.msrb.mxu2 %v125_v20  ;;  %243 = vmatpush.msrb.mxu1 %v110_v22 }
  0x31   :  { %224 = vmatpush.msrb.mxu0 %v93_v21 }
  0x32   :  { %265 = vmatpush.msrb.mxu2 %v124_v24  ;;  %244 = vmatpush.msrb.mxu1 %v109_v26 }
  0x33   :  { %225 = vmatpush.msrb.mxu0 %v92_v25 }
  0x34   :  { %153 = vmatmul.f32.vlgmr.msra.gmra.mxu0 %v14_v27  ;;  %266 = vmatpush.msrb.mxu2 %v123_v28 }
  0x35   :  { %226 = vmatpush.msrb.mxu0 %v91_v29  ;;  %245 = vmatpush.msrb.mxu1 %v108_v30 }
  0x36   :  { %267 = vmatpush.msrb.mxu2 %v122_v32 }
  0x37   :  { %227 = vmatpush.msrb.mxu0 %v90_v33  ;;  %246 = vmatpush.msrb.mxu1 %v107_v34 }
  0x38   :  { %268 = vmatpush.msrb.mxu2 %v121_v35 }
  0x39   :  { %228 = vmatpush.msrb.mxu0 %v89_v36  ;;  %247 = vmatpush.msrb.mxu1 %v106_v37 }
  0x3a   :  { %269 = vmatpush.msrb.mxu2 %v120_v38 }
  0x3b   :  { %229 = vmatpush.msrb.mxu0 %v88_v39  ;;  %248 = vmatpush.msrb.mxu1 %v105_v40 }
  0x3c   :  { %270 = vmatpush.msrb.mxu2 %v119_v41 }
  0x3d   :  { %230 = vmatpush.msrb.mxu0 %v87_v43  ;;  %249 = vmatpush.msrb.mxu1 %v104_v44 }
  0x3e   :  { %271 = vmatpush.msrb.mxu2 %v118_v45 }
  0x3f   :  { %231 = vmatpush.msrb.mxu0 %v86_v46  ;;  %250 = vmatpush.msrb.mxu1 %v103_v47 }
  0x40   :  { %272 = vmatpush.msrb.mxu2 %v117_v48 }
  0x41   :  { %273 = vmatmul.f32.vlgmr.msrb.gmra.mxu2 %v20_v49  ;;  %232 = vmatpush.msrb.mxu0 %v85_v50 }
  0x42   :  { %251 = vmatpush.msrb.mxu1 %v102_v51  ;;  %233 = vmatmul.f32.vlgmr.msrb.gmra.mxu0 %v18_v52 }
  0x44   :  { %252 = vmatpush.msrb.mxu1 %v101_v53 }
  0x45   :  { %253 = vmatmul.f32.vlgmr.msrb.gmra.mxu1 %v19_v54 }
  0xaa   :  { %v174_v58 = vpop.f32.mrf.mxu1  ;;  %v194_v59 = vpop.f32.mrf.mxu2 }
  0xae   :  { %v214_v61 = vpop.f32.mrf.mxu3 }
  0xb1   :  { %v154_v56 = vpop.f32.mrf.mxu0 }
  0xb2   :  { %v155_v57 = vadd.f32 %v282_v55, %v154_v56 }
  0xb4   :  { %v175_v60 = vadd.f32 %v174_v58, %v155_v57 }
  0xb6   :  { %v195_v62 = vadd.f32 %v194_v59, %v175_v60 }
  0xb8   :  { %v215_v63 = vadd.f32 %v214_v61, %v195_v62 }
  0xbf   :  { %v234_v0 = vpop.f32.mrf.mxu0 }
  0xc0   :  { %v235_v1 = vadd.f32 %v234_v0, %v215_v63 }
  0xc2   :  { %v254_v2 = vpop.f32.mrf.mxu1 }
  0xc3   :  { %v255_v3 = vadd.f32 %v254_v2, %v235_v1 }
  0xc4   :  { %v274_v4 = vpop.f32.mrf.mxu2 }
  0xc5   :  { %v275_v5 = vadd.f32 %v274_v4, %v255_v3 }
  0xc7   :  { %277 = vst [vmem:[%s669_s3] sm:$0xff] %v275_v5 }

</bundles_post_ra>
